<compile_context>
chip_gen: v7x
topology: tpu7x:2x2x1
jax: 0.10.0
libtpu: 0.0.40
codegen_flags: <defaults>
</compile_context>

<pallas_src>
import functools
import math

import jax
import jax.numpy as jnp
from jax.experimental import pallas as pl
from jax.experimental.pallas import tpu as pltpu

_LANES = 128
_MIN_PALLAS_ELEMS = 1024  # below this a kernel launch is not worth it


def _sublane_multiple(dtype) -> int:
    # Native sublane packing: 8 rows for 32-bit, 16 for 16-bit, 32 for 8-bit.
    return {4: 8, 2: 16, 1: 32}.get(jnp.dtype(dtype).itemsize, 8)


@functools.lru_cache(maxsize=1)
def _block_config():
    """(per-pipeline-buffer bytes, vmem_limit_bytes), generation-aware."""
    try:
        vmem_cap = pltpu.get_tpu_info().vmem_capacity_bytes
    except Exception:
        vmem_cap = None
    if vmem_cap is None:
        # Unknown chip: conservative sizing that is safe everywhere.
        return 4 << 20, 32 << 20
    if vmem_cap <= (64 << 20):
        # v7x-class: 64 MiB VMEM/TC.  in+out double-buffered @8 MiB = 32 MiB.
        return 8 << 20, 48 << 20
    # v5e / v6e: 128 MiB VMEM.  Larger blocks amortize ~0.35 us/step overhead.
    return 12 << 20, 80 << 20


def _act_quant_kernel(x_ref, o_ref, *, a_bit: int):
    # Compute in f32 regardless of storage dtype (correctness for bf16 inputs).
    x = x_ref[...].astype(jnp.float32)
    xc = jnp.clip(x, 0.0, 1.0)
    if a_bit == 1:
        q = jnp.sign(xc)
    else:
        n = float(2 ** a_bit - 1)
        # jnp.round == torch.round (round-half-to-even)
        q = jnp.round(xc * n) / n
    o_ref[...] = q.astype(o_ref.dtype)


def _quant_pallas_2d(x2d: jax.Array, a_bit: int) -> jax.Array:
    """Run the elementwise quantizer on a lane-dense (rows, 128) slab."""
    rows = x2d.shape[0]
    dtype = x2d.dtype
    itemsize = jnp.dtype(dtype).itemsize
    sub = _sublane_multiple(dtype)
    block_bytes, vmem_limit = _block_config()

    # Bound rows by the *f32-equivalent* block footprint so the in-kernel f32
    # upcast of narrow dtypes stays inside the VMEM budget.
    max_rows = max(sub, block_bytes // (_LANES * max(itemsize, 4)))
    block_rows = min(rows, max_rows)
    if block_rows >= sub:
        # Partial-extent block: keep it a multiple of the sublane pack.  The
        # last grid block may be partial (rows % block_rows != 0) — Pallas
        # masks the out-of-bounds writes, so no host-side pad/slice is needed.
        block_rows = (block_rows // sub) * sub
    else:
        # Tiny slab: a full-extent block is always legal.
        block_rows = rows
    grid = (pl.cdiv(rows, block_rows),)

    return pl.pallas_call(
        functools.partial(_act_quant_kernel, a_bit=a_bit),
        out_shape=jax.ShapeDtypeStruct((rows, _LANES), dtype),
        grid_spec=pltpu.PrefetchScalarGridSpec(
            num_scalar_prefetch=0,
            grid=grid,
            in_specs=[pl.BlockSpec((block_rows, _LANES), lambda i: (i, 0))],
            out_specs=pl.BlockSpec((block_rows, _LANES), lambda i: (i, 0)),
        ),
        compiler_params=pltpu.CompilerParams(
            # NOTE: plain "parallel" does not by itself engage both v7x
            # TensorCores; a CORE_PARALLEL leading axis would be needed and is
            # left out pending an xprof check that one TC cannot saturate HBM.
            dimension_semantics=("parallel",),
            vmem_limit_bytes=vmem_limit,
        ),
    )(x2d)


def _quant_ref(x: jax.Array, a_bit: int) -> jax.Array:
    """Pure-jnp reference / tiny-tensor path (computed in f32)."""
    xf = x.astype(jnp.float32)
    if a_bit == 32:
        return xf
    xc = jnp.clip(xf, 0.0, 1.0)
    if a_bit == 1:
        return jnp.sign(xc)
    n = float(2 ** a_bit - 1)
    return jnp.round(xc * n) / n


def activation_quantize(x: jax.Array, a_bit: int) -> jax.Array:
    """Elementwise uniform activation quantization; hot path in Pallas."""
    assert a_bit <= 8 or a_bit == 32

    if a_bit == 32:
        # Identity: do not launch a kernel / burn HBM bandwidth.
        return x

    orig_shape = x.shape
    orig_dtype = x.dtype
    total = math.prod(orig_shape) if orig_shape else 1
    if total == 0:
        return x
    if total < _MIN_PALLAS_ELEMS:
        # Tiny tensor: plain jnp beats a kernel launch.
        return _quant_ref(x.reshape(-1), a_bit).astype(orig_dtype).reshape(orig_shape)

    flat = x.reshape(-1)

    if total % _LANES == 0:
        # Fast path: free reshape view — no pad, no slice, no concatenate.
        # Partial last grid block (rows % block_rows != 0) is handled by Pallas.
        out2d = _quant_pallas_2d(flat.reshape(-1, _LANES), a_bit)
        return out2d.reshape(orig_shape)

    # Truly ragged (total not a multiple of 128, rare for activations):
    # pad once with < 128 elements, quantize, strip the tail.
    pad = (-total) % _LANES
    padded = jnp.pad(flat, (0, pad))
    out2d = _quant_pallas_2d(padded.reshape(-1, _LANES), a_bit)
    return out2d.reshape(-1)[:total].reshape(orig_shape)


def _reference(x, a_bit):
    return _quant_ref(x, a_bit).astype(x.dtype) if a_bit != 32 else x


if __name__ == "__main__":
    key = jax.random.PRNGKey(0)
    k1, k2, k3, k4 = jax.random.split(key, 4)
    # NCHW activation tensors, small shapes.
    x_f32 = jax.random.normal(k1, (2, 4, 16, 16), dtype=jnp.float32)      # lane aligned
    x_partial = jax.random.normal(k2, (2, 4, 16, 20), dtype=jnp.float32)  # %128 ok, partial last block
    x_ragged = jax.random.normal(k3, (3, 4, 16, 17), dtype=jnp.float32)   # total % 128 != 0
    x_tiny = jax.random.normal(k4, (2, 4, 4, 4), dtype=jnp.float32)       # jnp path
    x_bf16 = x_f32.astype(jnp.bfloat16)

    cases = []
    for a_bit in (4, 1, 32):
        cases.append((f"f32/a_bit={a_bit}", x_f32, a_bit))
        cases.append((f"partial/a_bit={a_bit}", x_partial, a_bit))
        cases.append((f"ragged/a_bit={a_bit}", x_ragged, a_bit))
    cases.append(("tiny/a_bit=4", x_tiny, 4))
    cases.append(("bf16/a_bit=4", x_bf16, 4))
    cases.append(("bf16/a_bit=1", x_bf16, 1))

    ok = True
    for name, xin, a_bit in cases:
        out = jax.block_until_ready(activation_quantize(xin, a_bit))
        ref = _reference(xin, a_bit)
        if out.shape != xin.shape or out.dtype != xin.dtype:
            ok = False
            print(f"SHAPE/DTYPE MISMATCH for {name}")
        elif not jnp.allclose(out.astype(jnp.float32), ref.astype(jnp.float32),
                              atol=1e-6):
            ok = False
            print(f"MISMATCH for {name}")

    if ok:
        print("KERNEL_OK")
</pallas_src>

<mosaic_0001>
module attributes {stable_mosaic.version = 11 : i64} {
  func.func @_act_quant_kernel(%arg0: i32, %arg1: memref<16x128xf32, #tpu.memory_space<vmem>>, %arg2: memref<16x128xf32, #tpu.memory_space<vmem>>) attributes {dimension_semantics = [#tpu.dimension_semantics<parallel>], iteration_bounds = array<i64: 1>, scalar_prefetch = 0 : i64, scratch_operands = 0 : i64, tpu.core_type = #tpu.core_type<tc>, window_params = [{transform_indices = @transform_0, window_bounds = array<i64: 16, 128>}, {transform_indices = @transform_1, window_bounds = array<i64: 16, 128>}]} {
    %c0 = arith.constant 0 : index
    %c0_0 = arith.constant 0 : index
    %0 = vector.load %arg1[%c0, %c0_0] : memref<16x128xf32, #tpu.memory_space<vmem>>, vector<16x128xf32>
    %cst = arith.constant 0.000000e+00 : f32
    %cst_1 = arith.constant 1.000000e+00 : f32
    %1 = vector.broadcast %cst : f32 to vector<16x128xf32>
    %2 = arith.maximumf %1, %0 : vector<16x128xf32>
    %3 = vector.broadcast %cst_1 : f32 to vector<16x128xf32>
    %4 = arith.minimumf %3, %2 : vector<16x128xf32>
    %cst_2 = arith.constant 1.500000e+01 : f32
    %5 = vector.broadcast %cst_2 : f32 to vector<16x128xf32>
    %6 = arith.mulf %4, %5 : vector<16x128xf32>
    %7 = math.roundeven %6 : vector<16x128xf32>
    %cst_3 = arith.constant 1.500000e+01 : f32
    %8 = vector.broadcast %cst_3 : f32 to vector<16x128xf32>
    %9 = arith.divf %7, %8 : vector<16x128xf32>
    %c0_4 = arith.constant 0 : index
    %c0_5 = arith.constant 0 : index
    %10 = vector.load %arg2[%c0_4, %c0_5] : memref<16x128xf32, #tpu.memory_space<vmem>>, vector<16x128xf32>
    tpu.vector_store %arg2[%c0_4, %c0_5], %9 {strides = array<i32>} : memref<16x128xf32, #tpu.memory_space<vmem>>, vector<16x128xf32>,
    return
  }
  func.func @transform_0(%arg0: i32) -> (i32, i32) {
    %c0_i32 = arith.constant 0 : i32
    %c0_i32_0 = arith.constant 0 : i32
    return %arg0, %c0_i32 : i32, i32
  }
  func.func @transform_1(%arg0: i32) -> (i32, i32) {
    %c0_i32 = arith.constant 0 : i32
    %c0_i32_0 = arith.constant 0 : i32
    return %arg0, %c0_i32 : i32, i32
  }
}

</mosaic_0001>

<bundles_post_ra>
// kernel: tpu_custom_call.1
= control target key start
LH: loop header
LB: loop body
LE: loop exit
PB: predicated region body
PF: predicated region fallthrough
CT: control target
= control target key end

     0   :  { %6 = vsyncpa [#allocation3], 0  ;;  %s153_s0 = inlined_call_operand.hbm [shape: f32[16,128], index: 0, kind: input, shape index: {}]   ;;  %s154_s1 = inlined_call_operand.hbm [shape: f32[16,128], index: 1, kind: output, shape index: {}]  }
   0x1   :  { %7 = vsyncpa [#allocation4], 0  ;;  %s109_s6 = smov [#allocation2]   ;;  %s61_s10 = scalar_lea.hbm %s153_s0, 256 }
   0x2   :  { %s13_s7 = sshll.u32 %s109_s6, 4  ;;  %p62_p0 = scmp.ne.s32.totalorder %s153_s0, %s61_s10  ;;  %s14_s7 = int_to_ptr.vmem [resolvable:$true] %s13_s7 }
   0x3   :  { %p65_p1 = scmp.lt.u32.totalorder %s61_s10, %s153_s0 }
   0x5   :  { %p67_p2 = pnand %p65_p1, %p62_p0 }
   0x7   :  { %70 = shalt.err (!%p67_p2)
}
   0x8   :  { %s71_s15 = scalar_lea.vmem %s14_s7, 256  ;;  %p76_p4 = scmp.lt.s32.totalorder %s14_s7, %s14_s7 }
   0x9   :  { %p72_p3 = scmp.ne.s32.totalorder %s14_s7, %s71_s15  ;;  %p77_p5 = scmp.lt.s32.totalorder %s71_s15, %s71_s15 }
   0xb   :  { %p78_p6 = por %p77_p5, %p76_p4 }
   0xd   :  { %p79_p7 = pnand %p78_p6, %p72_p3 }
   0xf   :  { %82 = shalt.err (!%p79_p7)
}
  0x10   :  { %s110_s16 = smov 128   ;;  %s111_s17 = smov 8  }
  0x11   :  { %19 = dma.hbm_to_vmem [thread:$0]  %s153_s0, 256, %s14_s7, [#allocation3], %s110_s16, %s110_s16, %s111_s17  }
  0x12   :  { %105 = dma.done.wait [#allocation3], 256  }
  0x13   :  { %106 = vsyncadd [#allocation3], 4294967040  ;;  %v23_v0 = vld [vmem:[#allocation2] sm:$0xff]  ;;  %v24_v1 = vld [vmem:[#allocation2 + $0x8] sm:$0xff]  ;;  %s112_s20 = smov [#allocation5]  }
  0x14   :  { %v25_v2 = vmax.f32 %v23_v0, 0.0  ;;  %v26_v3 = vmax.f32 %v24_v1, 0.0  ;;  %s43_s21 = sshll.u32 %s112_s20, 4  ;;  %s44_s21 = int_to_ptr.vmem [resolvable:$true] %s43_s21 }
  0x15   :  { %s83_s0 = scalar_lea.vmem %s44_s21, 256  ;;  %p88_p9 = scmp.lt.s32.totalorder %s44_s21, %s44_s21 }
  0x16   :  { %v27_v4 = vmin.f32 %v25_v2, 1.0  ;;  %v28_v5 = vmin.f32 %v26_v3, 1.0  ;;  %p84_p8 = scmp.ne.s32.totalorder %s44_s21, %s83_s0  ;;  %p89_p10 = scmp.lt.s32.totalorder %s83_s0, %s83_s0 }
  0x18   :  { %v29_v6 = vmul.f32 15.0, %v27_v4  ;;  %v30_v7 = vmul.f32 15.0, %v28_v5  ;;  %p90_p11 = por %p89_p10, %p88_p9 }
  0x1a   :  { %v55_v8 = vround.rtne.f32 %v29_v6  ;;  %v56_v9 = vround.rtne.f32 %v30_v7  ;;  %p91_p12 = pnand %p90_p11, %p84_p8 }
  0x1c   :  { %v34_v10 = vmul.f32 0.06666667, %v55_v8  ;;  %v35_v11 = vmul.f32 0.06666667, %v56_v9 }
  0x1e   :  { %36 = vst [vmem:[#allocation5] sm:$0xff] %v34_v10  ;;  %37 = vst [vmem:[#allocation5 + $0x8] sm:$0xff] %v35_v11 }
  0x1f   :  { %94 = shalt.err (!%p91_p12)
}
  0x20   :  { %s95_s24 = scalar_lea.hbm %s154_s1, 256 }
  0x21   :  { %p96_p13 = scmp.ne.s32.totalorder %s154_s1, %s95_s24  ;;  %p99_p0 = scmp.lt.u32.totalorder %s95_s24, %s154_s1 }
  0x23   :  { %p101_p1 = pnand %p99_p0, %p96_p13 }
  0x25   :  { %104 = shalt.err (!%p101_p1)
}
  0x26   :  { %49 = dma.vmem_to_hbm [thread:$0]  %s44_s21, 256, %s154_s1, [#allocation4], %s110_s16, %s110_s16, %s111_s17  }
  0x27   :  { %107 = dma.done.wait [#allocation4], 256  }
  0x28   :  { %108 = vsyncadd [#allocation4], 4294967040 }
  0x29   :  { %53 = vsyncpa [#allocation3], 1 }
  0x2a   :  { %54 = vsyncpa [#allocation4], 1 }

</bundles_post_ra>
